<compile_context>
chip_gen: v6e
topology: v6e:2x2x1
jax: 0.10.0
libtpu: 0.0.40
codegen_flags: <defaults>
</compile_context>

<pallas_src>
import jax
import jax.numpy as jnp
from jax import lax
from jax.experimental import pallas as pl
from jax.experimental.pallas import tpu as pltpu

_LANE = 128
_SUBLANE = 8


def _round_up(n, m):
    return ((n + m - 1) // m) * m


def _vmem_capacity_bytes():
    """Physical VMEM of the local TPU generation; conservative fallback."""
    try:
        return int(pltpu.get_tpu_info().vmem_capacity_bytes)
    except Exception:
        return 64 << 20  # safe on every generation (v7x has 64 MiB per TC)


# ---------------------------------------------------------------------------
# Kernels
# ---------------------------------------------------------------------------

def _resident_kernel(x_ref, w1_ref, b1_ref, wres_ref, bres_ref,
                     w2_ref, b2_ref, o_ref):
    """One (tm, D_in_p) row tile through FC1 -> residual stack -> FC2.

    The whole wres stack stays resident in VMEM (single-buffered)."""
    h = jnp.dot(x_ref[...], w1_ref[...],
                preferred_element_type=jnp.float32) + b1_ref[...]

    num_blocks = wres_ref.shape[0]

    def one_block(blk, h):
        # Linear -> ReLU -> Linear, then ReLU(t + h)   (nl_type='RL')
        bb = bres_ref[blk]                       # (2, H_p), lane-dense f32
        t = jnp.dot(h.astype(jnp.bfloat16), wres_ref[blk, 0],
                    preferred_element_type=jnp.float32) + bb[0:1, :]
        t = jnp.maximum(t, 0.0)
        t = jnp.dot(t.astype(jnp.bfloat16), wres_ref[blk, 1],
                    preferred_element_type=jnp.float32) + bb[1:2, :]
        return jnp.maximum(t + h, 0.0)

    if num_blocks <= 4:
        # Small fixed count: static unroll (scheduler-visible, no loop overhead).
        for blk in range(num_blocks):
            h = one_block(blk, h)
    else:
        # Deeper stacks: a real loop boundary bounds vreg live ranges / spills
        # (a static Python `for` does not); unroll=2 keeps the scheduler fed.
        h = lax.fori_loop(0, num_blocks, one_block, h, unroll=2)

    y = jnp.dot(h.astype(jnp.bfloat16), w2_ref[...],
                preferred_element_type=jnp.float32) + b2_ref[...]
    o_ref[...] = y.astype(o_ref.dtype)


def _stream_kernel(x_ref, w1_ref, b1_ref, wres_ref, bres_ref,
                   w2_ref, b2_ref, o_ref, h_ref):
    """One residual block per grid step along axis 1 (weights streamed,
    double-buffered by the normal Pallas pipeline); h carried in VMEM scratch."""
    k = pl.program_id(1)

    @pl.when(k == 0)
    def _():
        h_ref[...] = jnp.dot(x_ref[...], w1_ref[...],
                             preferred_element_type=jnp.float32) + b1_ref[...]

    h = h_ref[...]
    bb = bres_ref[0]                             # (2, H_p)
    t = jnp.dot(h.astype(jnp.bfloat16), wres_ref[0, 0],
                preferred_element_type=jnp.float32) + bb[0:1, :]
    t = jnp.maximum(t, 0.0)
    t = jnp.dot(t.astype(jnp.bfloat16), wres_ref[0, 1],
                preferred_element_type=jnp.float32) + bb[1:2, :]
    h_new = jnp.maximum(t + h, 0.0)
    h_ref[...] = h_new

    @pl.when(k == pl.num_programs(1) - 1)
    def _():
        y = jnp.dot(h_new.astype(jnp.bfloat16), w2_ref[...],
                    preferred_element_type=jnp.float32) + b2_ref[...]
        o_ref[...] = y.astype(o_ref.dtype)


def _mlp_only_kernel(x_ref, w1_ref, b1_ref, w2_ref, b2_ref, o_ref):
    """num_blocks == 0 edge case: just FC1 -> FC2."""
    h = jnp.dot(x_ref[...], w1_ref[...],
                preferred_element_type=jnp.float32) + b1_ref[...]
    y = jnp.dot(h.astype(jnp.bfloat16), w2_ref[...],
                preferred_element_type=jnp.float32) + b2_ref[...]
    o_ref[...] = y.astype(o_ref.dtype)


# ---------------------------------------------------------------------------
# Wrapper
# ---------------------------------------------------------------------------

def res_block_forward(x, params, *, tm_target=512, force_stream=False):
    """x: (..., D_in) float32 -> (..., D_out) float32.

    nn.Linear acts on the last axis; leading axes (batch, D_agent, ...) are
    flattened into the row dimension and restored afterwards.
    """
    w1, b1 = params["w1"], params["b1"]          # (D_in, H), (H,)
    wres, bres = params["wres"], params["bres"]  # (nb, 2, H, H), (nb, 2, H)
    w2, b2 = params["w2"], params["b2"]          # (H, D_out), (D_out,)

    lead = x.shape[:-1]
    D_in = x.shape[-1]
    H = w1.shape[1]
    D_out = w2.shape[1]
    num_blocks = wres.shape[0]

    N = 1
    for d in lead:
        N *= d

    # ---- lane-dense padding (zero rows/cols + zero bias + ReLU keep the
    # valid lanes bit-identical) ---------------------------------------------
    D_in_p = _round_up(D_in, _LANE)
    H_p = _round_up(H, _LANE)
    D_out_p = _round_up(D_out, _LANE)

    # ---- adaptive row tile: <=1 tile of padding waste, >=2 grid steps when N
    # allows (so v7x's two TensorCores both get work on the "parallel" axis) --
    n_tiles = 1 if N <= _SUBLANE else max(2, -(-N // tm_target))
    tm = max(_SUBLANE, _round_up(-(-N // n_tiles), _SUBLANE))
    N_p = _round_up(N, tm)
    n_row_tiles = N_p // tm

    x2d = x.reshape(N, D_in).astype(jnp.bfloat16)
    x2d = jnp.pad(x2d, ((0, N_p - N), (0, D_in_p - D_in)))

    def pad2(w, r, c):
        return jnp.pad(w, ((0, r - w.shape[0]), (0, c - w.shape[1])))

    w1_p = pad2(w1, D_in_p, H_p).astype(jnp.bfloat16)
    w2_p = pad2(w2, H_p, D_out_p).astype(jnp.bfloat16)
    b1_p = jnp.pad(b1, (0, H_p - H)).astype(jnp.float32)[None, :]
    b2_p = jnp.pad(b2, (0, D_out_p - D_out)).astype(jnp.float32)[None, :]

    # ---- VMEM budgeting (generation aware) ----------------------------------
    cap = _vmem_capacity_bytes()
    budget = int(cap * 0.85)      # headroom for Mosaic internal scratch / sems

    io_bytes = 2 * tm * D_in_p * 2 + 2 * tm * D_out_p * 4  # double-buffered x/out
    tmp_bytes = 6 * tm * H_p * 4                            # f32 / bf16 intermediates
    fixed_w_bytes = (w1_p.size + w2_p.size) * 2 + (b1_p.size + b2_p.size) * 4

    def weight_spec(shape, index_map):
        # Grid-invariant operand: single buffer (no pointless double-buffering).
        return pl.BlockSpec(shape, index_map, pipeline_mode=pl.Buffered(1))

    def launch(kernel, grid, in_specs, scratch_shapes, semantics, footprint, args):
        vmem_limit = min(budget, max(int(footprint * 3 // 2), 32 << 20))
        return pl.pallas_call(
            kernel,
            out_shape=jax.ShapeDtypeStruct((N_p, D_out_p), jnp.float32),
            grid_spec=pltpu.PrefetchScalarGridSpec(
                num_scalar_prefetch=0,
                grid=grid,
                in_specs=in_specs,
                out_specs=pl.BlockSpec((tm, D_out_p),
                                       (lambda i: (i, 0)) if len(grid) == 1
                                       else (lambda i, k: (i, 0))),
                scratch_shapes=scratch_shapes),
            compiler_params=pltpu.CompilerParams(
                dimension_semantics=semantics,
                vmem_limit_bytes=vmem_limit),
        )(*args)

    # ---- num_blocks == 0: plain FC1 -> FC2 ----------------------------------
    if num_blocks == 0:
        footprint = fixed_w_bytes + io_bytes + tmp_bytes
        out = launch(
            _mlp_only_kernel,
            grid=(n_row_tiles,),
            in_specs=[pl.BlockSpec((tm, D_in_p), lambda i: (i, 0)),
                      weight_spec(w1_p.shape, lambda i: (0, 0)),
                      weight_spec(b1_p.shape, lambda i: (0, 0)),
                      weight_spec(w2_p.shape, lambda i: (0, 0)),
                      weight_spec(b2_p.shape, lambda i: (0, 0))],
            scratch_shapes=[],
            semantics=("parallel",),
            footprint=footprint,
            args=(x2d, w1_p, b1_p, w2_p, b2_p))
        return out[:N, :D_out].reshape(*lead, D_out)

    wres_p = jnp.pad(wres, ((0, 0), (0, 0),
                            (0, H_p - H), (0, H_p - H))).astype(jnp.bfloat16)
    bres_p = jnp.pad(bres, ((0, 0), (0, 0), (0, H_p - H))).astype(jnp.float32)

    resident_fp = (fixed_w_bytes + wres_p.size * 2 + bres_p.size * 4
                   + io_bytes + tmp_bytes)
    use_stream = force_stream or resident_fp > budget

    if not use_stream:
        # Weights-resident path (preferred on v5e/v6e and whenever it fits):
        # every operand but x / out has a constant index_map and Buffered(1).
        out = launch(
            _resident_kernel,
            grid=(n_row_tiles,),
            in_specs=[pl.BlockSpec((tm, D_in_p), lambda i: (i, 0)),
                      weight_spec(w1_p.shape, lambda i: (0, 0)),
                      weight_spec(b1_p.shape, lambda i: (0, 0)),
                      weight_spec(wres_p.shape, lambda i: (0, 0, 0, 0)),
                      weight_spec(bres_p.shape, lambda i: (0, 0, 0)),
                      weight_spec(w2_p.shape, lambda i: (0, 0)),
                      weight_spec(b2_p.shape, lambda i: (0, 0))],
            scratch_shapes=[],
            semantics=("parallel",),
            footprint=resident_fp,
            args=(x2d, w1_p, b1_p, wres_p, bres_p, w2_p, b2_p))
    else:
        # Block-streaming path (v7x / deep-wide stacks): weight VMEM bounded by
        # ~2 residual blocks (double-buffered) regardless of depth; the per-step
        # weight DMA overlaps the MXU chain via the normal Pallas pipeline.
        # TODO(synk): if a single (H_p, H_p) block still exceeds the VMEM budget,
        # additionally tile the hidden dimension.
        stream_fp = (fixed_w_bytes
                     + 2 * (2 * H_p * H_p * 2 + 2 * H_p * 4)
                     + tm * H_p * 4 + io_bytes + tmp_bytes)
        out = launch(
            _stream_kernel,
            grid=(n_row_tiles, num_blocks),
            in_specs=[pl.BlockSpec((tm, D_in_p), lambda i, k: (i, 0)),
                      weight_spec(w1_p.shape, lambda i, k: (0, 0)),
                      weight_spec(b1_p.shape, lambda i, k: (0, 0)),
                      pl.BlockSpec((1, 2, H_p, H_p), lambda i, k: (k, 0, 0, 0)),
                      pl.BlockSpec((1, 2, H_p), lambda i, k: (k, 0, 0)),
                      weight_spec(w2_p.shape, lambda i, k: (0, 0)),
                      weight_spec(b2_p.shape, lambda i, k: (0, 0))],
            scratch_shapes=[pltpu.VMEM((tm, H_p), jnp.float32)],
            semantics=("parallel", "arbitrary"),
            footprint=stream_fp,
            args=(x2d, w1_p, b1_p, wres_p, bres_p, w2_p, b2_p))

    # TODO(synk): for D_out << 128 consumers that accept bf16, emit a bf16
    # output and fuse this slice/reshape into the consumer to cut HBM traffic.
    return out[:N, :D_out].reshape(*lead, D_out)


# ---------------------------------------------------------------------------
# Parameter init & pure-JAX reference (same bf16-operand / f32-accumulate math)
# ---------------------------------------------------------------------------

def init_params(key, cfg):
    """Deterministic synthetic init (PyTorch-style uniform). Weights are (in, out)."""
    D_in, H, D_out = cfg[0], cfg[1], cfg[-1]
    mid = cfg[1:-1]
    assert all(m == H for m in mid), "middle cfg entries must match hidden dim"
    num_blocks = len(mid) - 1  # Res_layers builds len(cfg[1:-1]) - 1 blocks

    keys = jax.random.split(key, 4)

    def lin(k, fan_in, fan_out):
        s = 1.0 / jnp.sqrt(jnp.float32(fan_in))
        kw, kb = jax.random.split(k)
        w = jax.random.uniform(kw, (fan_in, fan_out), jnp.float32, -s, s)
        b = jax.random.uniform(kb, (fan_out,), jnp.float32, -s, s)
        return w, b

    w1, b1 = lin(keys[0], D_in, H)
    w2, b2 = lin(keys[1], H, D_out)
    s = 1.0 / jnp.sqrt(jnp.float32(H))
    wres = jax.random.uniform(keys[2], (num_blocks, 2, H, H), jnp.float32, -s, s)
    bres = jax.random.uniform(keys[3], (num_blocks, 2, H), jnp.float32, -s, s)
    return {"w1": w1, "b1": b1, "wres": wres, "bres": bres, "w2": w2, "b2": b2}


def reference_forward(x, p):
    # Matches the kernel numerics (bf16 MXU operands, f32 accumulate). For
    # bit-parity with fp32 PyTorch nn.Linear, keep fp32 operands instead.
    bf = jnp.bfloat16
    h = jnp.dot(x.reshape(-1, x.shape[-1]).astype(bf), p["w1"].astype(bf),
                preferred_element_type=jnp.float32) + p["b1"]
    for blk in range(p["wres"].shape[0]):
        t = jnp.dot(h.astype(bf), p["wres"][blk, 0].astype(bf),
                    preferred_element_type=jnp.float32) + p["bres"][blk, 0]
        t = jnp.maximum(t, 0.0)
        t = jnp.dot(t.astype(bf), p["wres"][blk, 1].astype(bf),
                    preferred_element_type=jnp.float32) + p["bres"][blk, 1]
        h = jnp.maximum(t + h, 0.0)
    y = jnp.dot(h.astype(bf), p["w2"].astype(bf),
                preferred_element_type=jnp.float32) + p["b2"]
    return y.reshape(*x.shape[:-1], -1)


if __name__ == "__main__":
    key = jax.random.PRNGKey(0)
    kx, kp, kp0 = jax.random.split(key, 3)

    # cfg = [in, H, H, H, out] -> FC1(16->32), 2 residual blocks of width 32, FC2(32->8)
    cfg = [16, 32, 32, 32, 8]
    batch, D_agent = 2, 4
    x = jax.random.normal(kx, (batch, D_agent, cfg[0]), jnp.float32)
    params = init_params(kp, cfg)

    # Weights-resident path (default on this size).
    y = res_block_forward(x, params)
    jax.block_until_ready(y)
    assert y.shape == (batch, D_agent, cfg[-1])
    y_ref = reference_forward(x, params)
    err = jnp.max(jnp.abs(y - y_ref))
    assert jnp.allclose(y, y_ref, atol=2e-2, rtol=2e-2), \
        f"resident path mismatch vs reference, max abs err = {err}"

    # Block-streaming (v7x-style) path, exercised explicitly on the same data.
    y_s = res_block_forward(x, params, force_stream=True)
    jax.block_until_ready(y_s)
    err_s = jnp.max(jnp.abs(y_s - y_ref))
    assert jnp.allclose(y_s, y_ref, atol=2e-2, rtol=2e-2), \
        f"streaming path mismatch vs reference, max abs err = {err_s}"

    # Zero-residual-block edge case (cfg with a single hidden entry).
    cfg0 = [16, 32, 8]
    params0 = init_params(kp0, cfg0)
    y0 = res_block_forward(x, params0)
    jax.block_until_ready(y0)
    y0_ref = reference_forward(x, params0)
    err0 = jnp.max(jnp.abs(y0 - y0_ref))
    assert jnp.allclose(y0, y0_ref, atol=2e-2, rtol=2e-2), \
        f"no-residual path mismatch vs reference, max abs err = {err0}"

    print("KERNEL_OK")
</pallas_src>

<mosaic_0001>
module attributes {stable_mosaic.version = 11 : i64} {
  func.func @_resident_kernel(%arg0: i32, %arg1: memref<8x128xbf16, #tpu.memory_space<vmem>>, %arg2: memref<128x128xbf16, #tpu.memory_space<vmem>>, %arg3: memref<1x128xf32, #tpu.memory_space<vmem>>, %arg4: memref<2x2x128x128xbf16, #tpu.memory_space<vmem>>, %arg5: memref<2x2x128xf32, #tpu.memory_space<vmem>>, %arg6: memref<128x128xbf16, #tpu.memory_space<vmem>>, %arg7: memref<1x128xf32, #tpu.memory_space<vmem>>, %arg8: memref<8x128xf32, #tpu.memory_space<vmem>>) attributes {dimension_semantics = [#tpu.dimension_semantics<parallel>], iteration_bounds = array<i64: 1>, scalar_prefetch = 0 : i64, scratch_operands = 0 : i64, tpu.core_type = #tpu.core_type<tc>, window_params = [{transform_indices = @transform_0, window_bounds = array<i64: 8, 128>}, {pipeline_mode = #tpu.pipeline_mode<synchronous>, transform_indices = @transform_1, window_bounds = array<i64: 128, 128>}, {pipeline_mode = #tpu.pipeline_mode<synchronous>, transform_indices = @transform_2, window_bounds = array<i64: 1, 128>}, {pipeline_mode = #tpu.pipeline_mode<synchronous>, transform_indices = @transform_3, window_bounds = array<i64: 2, 2, 128, 128>}, {pipeline_mode = #tpu.pipeline_mode<synchronous>, transform_indices = @transform_4, window_bounds = array<i64: 2, 2, 128>}, {pipeline_mode = #tpu.pipeline_mode<synchronous>, transform_indices = @transform_5, window_bounds = array<i64: 128, 128>}, {pipeline_mode = #tpu.pipeline_mode<synchronous>, transform_indices = @transform_6, window_bounds = array<i64: 1, 128>}, {transform_indices = @transform_7, window_bounds = array<i64: 8, 128>}]} {
    %c0 = arith.constant 0 : index
    %c0_0 = arith.constant 0 : index
    %0 = vector.load %arg1[%c0, %c0_0] : memref<8x128xbf16, #tpu.memory_space<vmem>>, vector<8x128xbf16>
    %c0_1 = arith.constant 0 : index
    %c0_2 = arith.constant 0 : index
    %1 = vector.load %arg2[%c0_1, %c0_2] : memref<128x128xbf16, #tpu.memory_space<vmem>>, vector<128x128xbf16>
    %cst = arith.constant dense<0.000000e+00> : vector<8x128xf32>
    %2 = tpu.matmul %0, %1, %cst {dimension_numbers = #tpu.dot_dimension_numbers<[1], [0], [0], [1], [0, 0, 1, 1], [], []>} : vector<8x128xbf16>, vector<128x128xbf16>, vector<8x128xf32> -> vector<8x128xf32>
    %c0_3 = arith.constant 0 : index
    %c0_4 = arith.constant 0 : index
    %3 = vector.load %arg3[%c0_3, %c0_4] : memref<1x128xf32, #tpu.memory_space<vmem>>, vector<1x128xf32>
    %4 = vector.broadcast %3 : vector<1x128xf32> to vector<8x128xf32>
    %5 = arith.addf %2, %4 : vector<8x128xf32>
    %c0_5 = arith.constant 0 : index
    %c0_6 = arith.constant 0 : index
    %c0_7 = arith.constant 0 : index
    %6 = vector.load %arg5[%c0_5, %c0_6, %c0_7] : memref<2x2x128xf32, #tpu.memory_space<vmem>>, vector<1x2x128xf32>
    %7 = vector.shape_cast %6 : vector<1x2x128xf32> to vector<2x128xf32>
    %8 = arith.truncf %5 : vector<8x128xf32> to vector<8x128xbf16>
    %c0_8 = arith.constant 0 : index
    %c0_9 = arith.constant 0 : index
    %c0_10 = arith.constant 0 : index
    %c0_11 = arith.constant 0 : index
    %9 = vector.load %arg4[%c0_8, %c0_9, %c0_10, %c0_11] : memref<2x2x128x128xbf16, #tpu.memory_space<vmem>>, vector<1x1x128x128xbf16>
    %10 = vector.shape_cast %9 : vector<1x1x128x128xbf16> to vector<128x128xbf16>
    %cst_12 = arith.constant dense<0.000000e+00> : vector<8x128xf32>
    %11 = tpu.matmul %8, %10, %cst_12 {dimension_numbers = #tpu.dot_dimension_numbers<[1], [0], [0], [1], [0, 0, 1, 1], [], []>} : vector<8x128xbf16>, vector<128x128xbf16>, vector<8x128xf32> -> vector<8x128xf32>
    %12 = vector.extract_strided_slice %7 {offsets = [0, 0], sizes = [1, 128], strides = [1, 1]} : vector<2x128xf32> to vector<1x128xf32>
    %13 = vector.broadcast %12 : vector<1x128xf32> to vector<8x128xf32>
    %14 = arith.addf %11, %13 : vector<8x128xf32>
    %cst_13 = arith.constant 0.000000e+00 : f32
    %15 = vector.broadcast %cst_13 : f32 to vector<8x128xf32>
    %16 = arith.maximumf %14, %15 : vector<8x128xf32>
    %17 = arith.truncf %16 : vector<8x128xf32> to vector<8x128xbf16>
    %c0_14 = arith.constant 0 : index
    %c1 = arith.constant 1 : index
    %c0_15 = arith.constant 0 : index
    %c0_16 = arith.constant 0 : index
    %18 = vector.load %arg4[%c0_14, %c1, %c0_15, %c0_16] : memref<2x2x128x128xbf16, #tpu.memory_space<vmem>>, vector<1x1x128x128xbf16>
    %19 = vector.shape_cast %18 : vector<1x1x128x128xbf16> to vector<128x128xbf16>
    %cst_17 = arith.constant dense<0.000000e+00> : vector<8x128xf32>
    %20 = tpu.matmul %17, %19, %cst_17 {dimension_numbers = #tpu.dot_dimension_numbers<[1], [0], [0], [1], [0, 0, 1, 1], [], []>} : vector<8x128xbf16>, vector<128x128xbf16>, vector<8x128xf32> -> vector<8x128xf32>
    %21 = vector.extract_strided_slice %7 {offsets = [1, 0], sizes = [1, 128], strides = [1, 1]} : vector<2x128xf32> to vector<1x128xf32>
    %22 = vector.broadcast %21 : vector<1x128xf32> to vector<8x128xf32>
    %23 = arith.addf %20, %22 : vector<8x128xf32>
    %24 = arith.addf %23, %5 : vector<8x128xf32>
    %cst_18 = arith.constant 0.000000e+00 : f32
    %25 = vector.broadcast %cst_18 : f32 to vector<8x128xf32>
    %26 = arith.maximumf %24, %25 : vector<8x128xf32>
    %c1_19 = arith.constant 1 : index
    %c0_20 = arith.constant 0 : index
    %c0_21 = arith.constant 0 : index
    %27 = vector.load %arg5[%c1_19, %c0_20, %c0_21] : memref<2x2x128xf32, #tpu.memory_space<vmem>>, vector<1x2x128xf32>
    %28 = vector.shape_cast %27 : vector<1x2x128xf32> to vector<2x128xf32>
    %29 = arith.truncf %26 : vector<8x128xf32> to vector<8x128xbf16>
    %c1_22 = arith.constant 1 : index
    %c0_23 = arith.constant 0 : index
    %c0_24 = arith.constant 0 : index
    %c0_25 = arith.constant 0 : index
    %30 = vector.load %arg4[%c1_22, %c0_23, %c0_24, %c0_25] : memref<2x2x128x128xbf16, #tpu.memory_space<vmem>>, vector<1x1x128x128xbf16>
    %31 = vector.shape_cast %30 : vector<1x1x128x128xbf16> to vector<128x128xbf16>
    %cst_26 = arith.constant dense<0.000000e+00> : vector<8x128xf32>
    %32 = tpu.matmul %29, %31, %cst_26 {dimension_numbers = #tpu.dot_dimension_numbers<[1], [0], [0], [1], [0, 0, 1, 1], [], []>} : vector<8x128xbf16>, vector<128x128xbf16>, vector<8x128xf32> -> vector<8x128xf32>
    %33 = vector.extract_strided_slice %28 {offsets = [0, 0], sizes = [1, 128], strides = [1, 1]} : vector<2x128xf32> to vector<1x128xf32>
    %34 = vector.broadcast %33 : vector<1x128xf32> to vector<8x128xf32>
    %35 = arith.addf %32, %34 : vector<8x128xf32>
    %cst_27 = arith.constant 0.000000e+00 : f32
    %36 = vector.broadcast %cst_27 : f32 to vector<8x128xf32>
    %37 = arith.maximumf %35, %36 : vector<8x128xf32>
    %38 = arith.truncf %37 : vector<8x128xf32> to vector<8x128xbf16>
    %c1_28 = arith.constant 1 : index
    %c1_29 = arith.constant 1 : index
    %c0_30 = arith.constant 0 : index
    %c0_31 = arith.constant 0 : index
    %39 = vector.load %arg4[%c1_28, %c1_29, %c0_30, %c0_31] : memref<2x2x128x128xbf16, #tpu.memory_space<vmem>>, vector<1x1x128x128xbf16>
    %40 = vector.shape_cast %39 : vector<1x1x128x128xbf16> to vector<128x128xbf16>
    %cst_32 = arith.constant dense<0.000000e+00> : vector<8x128xf32>
    %41 = tpu.matmul %38, %40, %cst_32 {dimension_numbers = #tpu.dot_dimension_numbers<[1], [0], [0], [1], [0, 0, 1, 1], [], []>} : vector<8x128xbf16>, vector<128x128xbf16>, vector<8x128xf32> -> vector<8x128xf32>
    %42 = vector.extract_strided_slice %28 {offsets = [1, 0], sizes = [1, 128], strides = [1, 1]} : vector<2x128xf32> to vector<1x128xf32>
    %43 = vector.broadcast %42 : vector<1x128xf32> to vector<8x128xf32>
    %44 = arith.addf %41, %43 : vector<8x128xf32>
    %45 = arith.addf %44, %26 : vector<8x128xf32>
    %cst_33 = arith.constant 0.000000e+00 : f32
    %46 = vector.broadcast %cst_33 : f32 to vector<8x128xf32>
    %47 = arith.maximumf %45, %46 : vector<8x128xf32>
    %48 = arith.truncf %47 : vector<8x128xf32> to vector<8x128xbf16>
    %c0_34 = arith.constant 0 : index
    %c0_35 = arith.constant 0 : index
    %49 = vector.load %arg6[%c0_34, %c0_35] : memref<128x128xbf16, #tpu.memory_space<vmem>>, vector<128x128xbf16>
    %cst_36 = arith.constant dense<0.000000e+00> : vector<8x128xf32>
    %50 = tpu.matmul %48, %49, %cst_36 {dimension_numbers = #tpu.dot_dimension_numbers<[1], [0], [0], [1], [0, 0, 1, 1], [], []>} : vector<8x128xbf16>, vector<128x128xbf16>, vector<8x128xf32> -> vector<8x128xf32>
    %c0_37 = arith.constant 0 : index
    %c0_38 = arith.constant 0 : index
    %51 = vector.load %arg7[%c0_37, %c0_38] : memref<1x128xf32, #tpu.memory_space<vmem>>, vector<1x128xf32>
    %52 = vector.broadcast %51 : vector<1x128xf32> to vector<8x128xf32>
    %53 = arith.addf %50, %52 : vector<8x128xf32>
    %c0_39 = arith.constant 0 : index
    %c0_40 = arith.constant 0 : index
    %54 = vector.load %arg8[%c0_39, %c0_40] : memref<8x128xf32, #tpu.memory_space<vmem>>, vector<8x128xf32>
    tpu.vector_store %arg8[%c0_39, %c0_40], %53 {strides = array<i32>} : memref<8x128xf32, #tpu.memory_space<vmem>>, vector<8x128xf32>,
    return
  }
  func.func @transform_0(%arg0: i32) -> (i32, i32) {
    %c0_i32 = arith.constant 0 : i32
    %c0_i32_0 = arith.constant 0 : i32
    return %arg0, %c0_i32 : i32, i32
  }
  func.func @transform_1(%arg0: i32) -> (i32, i32) {
    %c0_i32 = arith.constant 0 : i32
    %c0_i32_0 = arith.constant 0 : i32
    %c0_i32_1 = arith.constant 0 : i32
    return %c0_i32, %c0_i32_0 : i32, i32
  }
  func.func @transform_2(%arg0: i32) -> (i32, i32) {
    %c0_i32 = arith.constant 0 : i32
    %c0_i32_0 = arith.constant 0 : i32
    %c0_i32_1 = arith.constant 0 : i32
    return %c0_i32, %c0_i32_0 : i32, i32
  }
  func.func @transform_3(%arg0: i32) -> (i32, i32, i32, i32) {
    %c0_i32 = arith.constant 0 : i32
    %c0_i32_0 = arith.constant 0 : i32
    %c0_i32_1 = arith.constant 0 : i32
    %c0_i32_2 = arith.constant 0 : i32
    %c0_i32_3 = arith.constant 0 : i32
    return %c0_i32, %c0_i32_0, %c0_i32_1, %c0_i32_2 : i32, i32, i32, i32
  }
  func.func @transform_4(%arg0: i32) -> (i32, i32, i32) {
    %c0_i32 = arith.constant 0 : i32
    %c0_i32_0 = arith.constant 0 : i32
    %c0_i32_1 = arith.constant 0 : i32
    %c0_i32_2 = arith.constant 0 : i32
    return %c0_i32, %c0_i32_0, %c0_i32_1 : i32, i32, i32
  }
  func.func @transform_5(%arg0: i32) -> (i32, i32) {
    %c0_i32 = arith.constant 0 : i32
    %c0_i32_0 = arith.constant 0 : i32
    %c0_i32_1 = arith.constant 0 : i32
    return %c0_i32, %c0_i32_0 : i32, i32
  }
  func.func @transform_6(%arg0: i32) -> (i32, i32) {
    %c0_i32 = arith.constant 0 : i32
    %c0_i32_0 = arith.constant 0 : i32
    %c0_i32_1 = arith.constant 0 : i32
    return %c0_i32, %c0_i32_0 : i32, i32
  }
  func.func @transform_7(%arg0: i32) -> (i32, i32) {
    %c0_i32 = arith.constant 0 : i32
    %c0_i32_0 = arith.constant 0 : i32
    return %arg0, %c0_i32 : i32, i32
  }
}

</mosaic_0001>

<bundles_post_ra>
// kernel: tpu_custom_call.1
= control target key start
LH: loop header
LB: loop body
LE: loop exit
PB: predicated region body
PF: predicated region fallthrough
CT: control target
= control target key end

     0   :  { %12 = vsyncpa [#allocation3], 0  ;;  %s1319_s0 = inlined_call_operand.hbm [shape: bf16[8,128], index: 0, kind: input, shape index: {}]   ;;  %s1320_s1 = inlined_call_operand.hbm [shape: bf16[128,128], index: 1, kind: input, shape index: {}]   ;;  %s1321_s2 = inlined_call_operand.vmem [shape: f32[1,128], index: 2, kind: input, shape index: {}]   ;;  %s1322_s3 = inlined_call_operand.hbm [shape: bf16[2,2,128,128], index: 3, kind: input, shape index: {}]   ;;  %s1323_s4 = inlined_call_operand.vmem [shape: f32[2,2,128], index: 4, kind: input, shape index: {}]   ;;  %s1324_s5 = inlined_call_operand.hbm [shape: bf16[128,128], index: 5, kind: input, shape index: {}]   ;;  %s1325_s6 = inlined_call_operand.vmem [shape: f32[1,128], index: 6, kind: input, shape index: {}]   ;;  %s1326_s7 = inlined_call_operand.hbm [shape: f32[8,128], index: 7, kind: output, shape index: {}]  }
   0x1   :  { %13 = vsyncpa [#allocation6], 0 }
   0x2   :  { %14 = vsyncpa [#allocation9], 0 }
   0x3   :  { %15 = vsyncpa [#allocation4], 0  ;;  %s1161_s24 = smov [#allocation5]  }
   0x4   :  { %s31_s25 = sshll.u32 %s1161_s24, 4  ;;  %s32_s25 = int_to_ptr.vmem [resolvable:$true] %s31_s25 }
   0x5   :  { %s1061_s26 = scalar_lea.vmem %s32_s25, 1024  ;;  %p1066_p1 = scmp.lt.s32.totalorder %s32_s25, %s32_s25 }
   0x6   :  { %p1062_p0 = scmp.ne.s32.totalorder %s32_s25, %s1061_s26  ;;  %p1067_p2 = scmp.lt.s32.totalorder %s1061_s26, %s1061_s26 }
   0x8   :  { %p1068_p3 = por %p1067_p2, %p1066_p1 }
   0xa   :  { %p1069_p4 = pnand %p1068_p3, %p1062_p0 }
   0xc   :  { %1072 = shalt.err (!%p1069_p4)
}
   0xd   :  { %s1162_s27 = smov 64   ;;  %s1163_s28 = smov 4  }
   0xe   :  { %37 = dma.hbm_to_vmem [thread:$0]  %s1320_s1, 1024, %s32_s25, [#allocation6], %s1162_s27, %s1162_s27, %s1163_s28  }
   0xf   :  { %s1164_s8 = smov [#allocation2]   ;;  %s1165_s10 = smov [#allocation7]  }
  0x10   :  { %s22_s9 = sshll.u32 %s1164_s8, 4  ;;  %s45_s11 = sshll.u32 %s1165_s10, 4  ;;  %s23_s9 = int_to_ptr.vmem [resolvable:$true] %s22_s9  ;;  %s46_s11 = int_to_ptr.vmem [resolvable:$true] %s45_s11 }
  0x11   :  { %s1081_s12 = scalar_lea.vmem %s23_s9, 64  ;;  %p1086_p6 = scmp.lt.s32.totalorder %s23_s9, %s23_s9 }
  0x12   :  { %p1082_p5 = scmp.ne.s32.totalorder %s23_s9, %s1081_s12  ;;  %p1087_p7 = scmp.lt.s32.totalorder %s1081_s12, %s1081_s12 }
  0x14   :  { %p1088_p8 = por %p1087_p7, %p1086_p6 }
  0x16   :  { %p1089_p9 = pnand %p1088_p8, %p1082_p5 }
  0x18   :  { %1092 = shalt.err (!%p1089_p9)
}
  0x19   :  { %25 = dma.hbm_to_vmem [thread:$0]  %s1319_s0, 64, %s23_s9, [#allocation3]  }
  0x1a   :  { %s1101_s15 = scalar_lea.vmem %s46_s11, 4096  ;;  %p1106_p11 = scmp.lt.s32.totalorder %s46_s11, %s46_s11 }
  0x1b   :  { %p1102_p10 = scmp.ne.s32.totalorder %s46_s11, %s1101_s15  ;;  %p1107_p12 = scmp.lt.s32.totalorder %s1101_s15, %s1101_s15 }
  0x1d   :  { %p1108_p13 = por %p1107_p12, %p1106_p11 }
  0x1f   :  { %p1109_p0 = pnand %p1108_p13, %p1102_p10 }
  0x21   :  { %1112 = shalt.err (!%p1109_p0)
}
  0x22   :  { %51 = dma.hbm_to_vmem [thread:$0]  %s1322_s3, 4096, %s46_s11, [#allocation6], %s1162_s27, %s1162_s27, %s1163_s28  }
  0x23   :  { %s1166_s17 = smov [#allocation8]  }
  0x24   :  { %s59_s18 = sshll.u32 %s1166_s17, 4  ;;  %s60_s18 = int_to_ptr.vmem [resolvable:$true] %s59_s18 }
  0x25   :  { %s1121_s19 = scalar_lea.vmem %s60_s18, 1024  ;;  %p1126_p2 = scmp.lt.s32.totalorder %s60_s18, %s60_s18 }
  0x26   :  { %p1122_p1 = scmp.ne.s32.totalorder %s60_s18, %s1121_s19  ;;  %p1127_p3 = scmp.lt.s32.totalorder %s1121_s19, %s1121_s19 }
  0x28   :  { %p1128_p4 = por %p1127_p3, %p1126_p2 }
  0x2a   :  { %p1129_p5 = pnand %p1128_p4, %p1122_p1 }
  0x2c   :  { %1132 = shalt.err (!%p1129_p5)
}
  0x2d   :  { %65 = dma.hbm_to_vmem [thread:$0]  %s1324_s5, 1024, %s60_s18, [#allocation9], %s1162_s27, %s1162_s27, %s1163_s28  }
  0x2e   :  { %1153 = dma.done.wait [#allocation3], 64  }
  0x2f   :  { %1154 = vsyncadd [#allocation3], 4294967232 }
  0x30   :  { %1155 = dma.done.wait [#allocation6], 5120  }
  0x31   :  { %1156 = vsyncadd [#allocation6], 4294962176 }
  0x32   :  { %1157 = dma.done.wait [#allocation9], 1024  }
  0x33   :  { %1158 = vsyncadd [#allocation9], 4294966272  ;;  %v1167_v0 = vmov 0.0   ;;  %vm1168_vm0 = vmmov 0   ;;  %v1005_v1 = vld [vmem:[#allocation5 + $0x38] sm:$0xff]   ;;  %v1006_v2 = vld [vmem:[#allocation5 + $0x30] sm:$0xff]   ;;  %v211_v39 = vlaneseq }
  0x34   :  { %876 = vmatprep.subr.bf16.mxu0 %v1167_v0  ;;  %892 = vmatprep.mubr.msk.bf16.mxu0 %vm1168_vm0, %v1167_v0  ;;  %v1007_v3 = vld [vmem:[#allocation5 + $0x28] sm:$0xff]   ;;  %v1013_v4 = vld [vmem:[#allocation7 + $0x38] sm:$0xff]   ;;  %v1008_v5 = vld [vmem:[#allocation5 + $0x20] sm:$0xff]   ;;  %s1169_s25 = smov [#allocation10]  }
  0x35   :  { %896 = vmatprep.subr.bf16.mxu1 %v1167_v0  ;;  %912 = vmatprep.mubr.msk.bf16.mxu1 %vm1168_vm0, %v1167_v0  ;;  %v1014_v6 = vld [vmem:[#allocation7 + $0x30] sm:$0xff]   ;;  %v1009_v7 = vld [vmem:[#allocation5 + $0x18] sm:$0xff]   ;;  %v1015_v8 = vld [vmem:[#allocation7 + $0x28] sm:$0xff]   ;;  %v1278_v40 = vshrl.u32 %v211_v39, 7  ;;  %s760_s26 = sshll.u32 %s1169_s25, 4  ;;  %s761_s26 = int_to_ptr.vmem [resolvable:$true] %s760_s26 }
  0x36   :  { %877 = vmatpush3.bf16.msra.mxu0 %v1005_v1  ;;  %897 = vmatpush3.bf16.msra.mxu1 %v1013_v4  ;;  %v1010_v9 = vld [vmem:[#allocation5 + $0x10] sm:$0xff]   ;;  %v1016_v10 = vld [vmem:[#allocation7 + $0x20] sm:$0xff]   ;;  %v1011_v11 = vld [vmem:[#allocation5 + $0x8] sm:$0xff]   ;;  %s1133_s27 = scalar_lea.vmem %s761_s26, 128  ;;  %p1138_p7 = scmp.lt.s32.totalorder %s761_s26, %s761_s26 }
  0x37   :  { %878 = vmatprep.subr.bf16.mxu0 %v1167_v0  ;;  %898 = vmatprep.subr.bf16.mxu1 %v1167_v0  ;;  %v1017_v12 = vld [vmem:[#allocation7 + $0x18] sm:$0xff]   ;;  %v1012_v13 = vld [vmem:[#allocation5] sm:$0xff]   ;;  %v1018_v14 = vld [vmem:[#allocation7 + $0x10] sm:$0xff]   ;;  %v213_v41 = vsub.s32 0, %v1278_v40  ;;  %v324_v59 = vsub.s32 1, %v1278_v40  ;;  %p1134_p6 = scmp.ne.s32.totalorder %s761_s26, %s1133_s27  ;;  %p1139_p8 = scmp.lt.s32.totalorder %s1133_s27, %s1133_s27 }
  0x38   :  { %v81_v15 = vld [vmem:[#allocation2] sm:$0xf]  ;;  %v1019_v16 = vld [vmem:[#allocation7 + $0x8] sm:$0xff]   ;;  %v1020_v17 = vld [vmem:[#allocation7] sm:$0xff]  }
  0x39   :  { %v1021_v18 = vld [vmem:[#allocation7 + $0x78] sm:$0xff]   ;;  %v1022_v19 = vld [vmem:[#allocation7 + $0x70] sm:$0xff]   ;;  %v1023_v20 = vld [vmem:[#allocation7 + $0x68] sm:$0xff]   ;;  %p1140_p9 = por %p1139_p8, %p1138_p7 }
  0x3a   :  { %879 = vmatpush3.bf16.msra.mxu0 %v1006_v2  ;;  %899 = vmatpush3.bf16.msra.mxu1 %v1014_v6  ;;  %v1024_v21 = vld [vmem:[#allocation7 + $0x60] sm:$0xff]   ;;  %v1025_v22 = vld [vmem:[#allocation7 + $0x58] sm:$0xff]   ;;  %v1026_v23 = vld [vmem:[#allocation7 + $0x50] sm:$0xff]  }
  0x3b   :  { %880 = vmatprep.subr.bf16.mxu0 %v1167_v0  ;;  %900 = vmatprep.subr.bf16.mxu1 %v1167_v0  ;;  %v771_v24 = vld [vmem:[%s1321_s2] ss:$0 sm:$0xff]  ;;  %v1027_v31 = vld [vmem:[#allocation7 + $0x48] sm:$0xff]   ;;  %v1028_v32 = vld [vmem:[#allocation7 + $0x40] sm:$0xff]   ;;  %p1141_p10 = pnand %p1140_p9, %p1134_p6 }
  0x3c   :  { %v1029_v33 = vld [vmem:[#allocation7 + $0xb8] sm:$0xff]   ;;  %v1030_v34 = vld [vmem:[#allocation7 + $0xb0] sm:$0xff]   ;;  %v1031_v35 = vld [vmem:[#allocation7 + $0xa8] sm:$0xff]  }
  0x3d   :  { %v1032_v36 = vld [vmem:[#allocation7 + $0xa0] sm:$0xff]   ;;  %v1033_v37 = vld [vmem:[#allocation7 + $0x98] sm:$0xff]   ;;  %v1034_v38 = vld [vmem:[#allocation7 + $0x90] sm:$0xff]  }
  0x3e   :  { %881 = vmatpush3.bf16.msra.mxu0 %v1007_v3  ;;  %901 = vmatpush3.bf16.msra.mxu1 %v1015_v8  ;;  %v193_v42 = vld [vmem:[%s1323_s4] sm:$0x3]  ;;  %v1035_v51 = vld [vmem:[#allocation7 + $0x88] sm:$0xff]   ;;  %v1036_v52 = vld [vmem:[#allocation7 + $0x80] sm:$0xff]  }
  0x3f   :  { %882 = vmatprep.subr.bf16.mxu0 %v1167_v0  ;;  %902 = vmatprep.subr.bf16.mxu1 %v1167_v0  ;;  %v214_v43 = vrot.slane %v193_v42, %v213_v41  ;;  %v1037_v53 = vld [vmem:[#allocation7 + $0xf8] sm:$0xff]   ;;  %v1038_v54 = vld [vmem:[#allocation7 + $0xf0] sm:$0xff]   ;;  %v1039_v55 = vld [vmem:[#allocation7 + $0xe8] sm:$0xff]   ;;  %v325_v60 = vrot.slane %v193_v42, %v324_v59 }
  0x40   :  { %v1040_v56 = vld [vmem:[#allocation7 + $0xe0] sm:$0xff]   ;;  %v1041_v57 = vld [vmem:[#allocation7 + $0xd8] sm:$0xff]   ;;  %v1042_v58 = vld [vmem:[#allocation7 + $0xd0] sm:$0xff]  }
  0x41   :  { %v1043_v6 = vld [vmem:[#allocation7 + $0xc8] sm:$0xff]   ;;  %v1045_v8 = vld [vmem:[#allocation8 + $0x38] sm:$0xff]  }
  0x42   :  { %883 = vmatpush3.bf16.msra.mxu0 %v1008_v5  ;;  %903 = vmatpush3.bf16.msra.mxu1 %v1016_v10  ;;  %v1047_v10 = vld [vmem:[#allocation8 + $0x28] sm:$0xff]  }
  0x43   :  { %884 = vmatprep.subr.bf16.mxu0 %v1167_v0  ;;  %904 = vmatprep.subr.bf16.mxu1 %v1167_v0 }
  0x46   :  { %885 = vmatpush3.bf16.msra.mxu0 %v1009_v7  ;;  %905 = vmatpush3.bf16.msra.mxu1 %v1017_v12  ;;  %v1044_v7 = vld [vmem:[#allocation7 + $0xc0] sm:$0xff]   ;;  %v1049_v12 = vld [vmem:[#allocation8 + $0x18] sm:$0xff]  }
  0x47   :  { %886 = vmatprep.subr.bf16.mxu0 %v1167_v0  ;;  %906 = vmatprep.subr.bf16.mxu1 %v1167_v0 }
  0x4a   :  { %887 = vmatpush3.bf16.msra.mxu0 %v1010_v9  ;;  %907 = vmatpush3.bf16.msra.mxu1 %v1018_v14  ;;  %v1046_v9 = vld [vmem:[#allocation8 + $0x30] sm:$0xff]   ;;  %v796_v14 = vld [vmem:[%s1323_s4 + $0x2] sm:$0x3] }
  0x4b   :  { %888 = vmatprep.subr.bf16.mxu0 %v1167_v0  ;;  %908 = vmatprep.subr.bf16.mxu1 %v1167_v0 }
  0x4e   :  { %889 = vmatpush3.bf16.msra.mxu0 %v1011_v11  ;;  %909 = vmatpush3.bf16.msra.mxu1 %v1019_v16  ;;  %v1048_v11 = vld [vmem:[#allocation8 + $0x20] sm:$0xff]  }
  0x4f   :  { %890 = vmatprep.subr.bf16.mxu0 %v1167_v0  ;;  %910 = vmatprep.subr.bf16.mxu1 %v1167_v0 }
  0x52   :  { %891 = vmatpush3.bf16.msra.mxu0 %v1012_v13  ;;  %911 = vmatpush3.bf16.msra.mxu1 %v1020_v17  ;;  %v1050_v13 = vld [vmem:[#allocation8 + $0x10] sm:$0xff]  }
  0x53   :  { %916 = vmatprep.subr.bf16.mxu0 %v1167_v0  ;;  %936 = vmatprep.subr.bf16.mxu1 %v1167_v0 }
  0x55   :  { %893 = vmatmul.mubr.bf16.vlgmr.msra.gmra.mxu0 %v81_v15  ;;  %v439_v15 = vrot.slane %v796_v14, %v213_v41 }
  0x56   :  { %932 = vmatprep.mubr.msk.bf16.mxu0 %vm1168_vm0, %v1167_v0  ;;  %917 = vmatpush3.bf16.msra.mxu0 %v1021_v18 }
  0x57   :  { %918 = vmatprep.subr.bf16.mxu0 %v1167_v0 }
  0x5a   :  { %919 = vmatpush3.bf16.msra.mxu0 %v1022_v19 }
  0x5b   :  { %920 = vmatprep.subr.bf16.mxu0 %v1167_v0 }
  0x5e   :  { %921 = vmatpush3.bf16.msra.mxu0 %v1023_v20 }
  0x5f   :  { %922 = vmatprep.subr.bf16.mxu0 %v1167_v0 }
  0x62   :  { %923 = vmatpush3.bf16.msra.mxu0 %v1024_v21 }
  0x63   :  { %924 = vmatprep.subr.bf16.mxu0 %v1167_v0 }
  0x66   :  { %925 = vmatpush3.bf16.msra.mxu0 %v1025_v22 }
  0x67   :  { %926 = vmatprep.subr.bf16.mxu0 %v1167_v0 }
  0x6a   :  { %927 = vmatpush3.bf16.msra.mxu0 %v1026_v23  ;;  %v1051_v23 = vld [vmem:[#allocation8 + $0x8] sm:$0xff]  }
  0x6b   :  { %928 = vmatprep.subr.bf16.mxu0 %v1167_v0 }
  0x6e   :  { %929 = vmatpush3.bf16.msra.mxu0 %v1027_v31 }
  0x6f   :  { %930 = vmatprep.subr.bf16.mxu0 %v1167_v0 }
  0x72   :  { %931 = vmatpush3.bf16.msra.mxu0 %v1028_v32 }
  0x73   :  { %956 = vmatprep.subr.bf16.mxu0 %v1167_v0 }
 0x115   :  { %v187_v25 = vpop.f32.mrf.mxu0 }
 0x116   :  { %v1264_v26 = vadd.f32 %v771_v24, %v187_v25  ;;  %v1052_v24 = vld [vmem:[#allocation8] sm:$0xff]   ;;  %v550_v25 = vrot.slane %v796_v14, %v324_v59 }
 0x117   :  { %v894_v27 = vpop.f32.mrf.mxu0 }
 0x118   :  { %v194_v28 = vpack.c.bf16 %v1264_v26, %v1264_v26 }
 0x119   :  { %v190_v29 = vpop.f32.mrf.mxu0 }
 0x11a   :  { %913 = vmatmul.mubr.bf16.vlgmr.msra.gmra.mxu1 %v194_v28 }
 0x11b   :  { %v895_v30 = vpop.f32.mrf.mxu0  ;;  %952 = vmatprep.mubr.msk.bf16.mxu1 %vm1168_vm0, %v1167_v0  ;;  %937 = vmatpush3.bf16.msra.mxu1 %v1029_v33 }
 0x11c   :  { %938 = vmatprep.subr.bf16.mxu1 %v1167_v0 }
 0x11f   :  { %939 = vmatpush3.bf16.msra.mxu1 %v1030_v34  ;;  %v813_v34 = vld [vmem:[%s1325_s6] ss:$0 sm:$0xff] }
 0x120   :  { %940 = vmatprep.subr.bf16.mxu1 %v1167_v0 }
 0x123   :  { %941 = vmatpush3.bf16.msra.mxu1 %v1031_v35 }
 0x124   :  { %942 = vmatprep.subr.bf16.mxu1 %v1167_v0 }
 0x127   :  { %943 = vmatpush3.bf16.msra.mxu1 %v1032_v36 }
 0x128   :  { %944 = vmatprep.subr.bf16.mxu1 %v1167_v0 }
 0x12b   :  { %945 = vmatpush3.bf16.msra.mxu1 %v1033_v37 }
 0x12c   :  { %946 = vmatprep.subr.bf16.mxu1 %v1167_v0 }
 0x12f   :  { %947 = vmatpush3.bf16.msra.mxu1 %v1034_v38 }
 0x130   :  { %948 = vmatprep.subr.bf16.mxu1 %v1167_v0 }
 0x133   :  { %949 = vmatpush3.bf16.msra.mxu1 %v1035_v51 }
 0x134   :  { %950 = vmatprep.subr.bf16.mxu1 %v1167_v0 }
 0x137   :  { %951 = vmatpush3.bf16.msra.mxu1 %v1036_v52 }
 0x138   :  { %976 = vmatprep.subr.bf16.mxu1 %v1167_v0 }
 0x1da   :  { %v297_v44 = vpop.f32.mrf.mxu1 }
 0x1db   :  { %v298_v45 = vadd.f32 %v297_v44, %v214_v43 }
 0x1dc   :  { %v914_v46 = vpop.f32.mrf.mxu1 }
 0x1dd   :  { %v303_v47 = vmax.f32 %v298_v45, 0.0 }
 0x1de   :  { %v300_v48 = vpop.f32.mrf.mxu1 }
 0x1df   :  { %v304_v49 = vpack.c.bf16 %v303_v47, %v303_v47 }
 0x1e0   :  { %v915_v50 = vpop.f32.mrf.mxu1 }
 0x1e1   :  { %933 = vmatmul.mubr.bf16.vlgmr.msra.gmra.mxu0 %v304_v49 }
 0x1e2   :  { %972 = vmatprep.mubr.msk.bf16.mxu0 %vm1168_vm0, %v1167_v0  ;;  %957 = vmatpush3.bf16.msra.mxu0 %v1037_v53 }
 0x1e3   :  { %958 = vmatprep.subr.bf16.mxu0 %v1167_v0 }
 0x1e6   :  { %959 = vmatpush3.bf16.msra.mxu0 %v1038_v54 }
 0x1e7   :  { %960 = vmatprep.subr.bf16.mxu0 %v1167_v0 }
 0x1ea   :  { %961 = vmatpush3.bf16.msra.mxu0 %v1039_v55 }
 0x1eb   :  { %962 = vmatprep.subr.bf16.mxu0 %v1167_v0 }
 0x1ee   :  { %963 = vmatpush3.bf16.msra.mxu0 %v1040_v56 }
 0x1ef   :  { %964 = vmatprep.subr.bf16.mxu0 %v1167_v0 }
 0x1f2   :  { %965 = vmatpush3.bf16.msra.mxu0 %v1041_v57 }
 0x1f3   :  { %966 = vmatprep.subr.bf16.mxu0 %v1167_v0 }
 0x1f6   :  { %967 = vmatpush3.bf16.msra.mxu0 %v1042_v58 }
 0x1f7   :  { %968 = vmatprep.subr.bf16.mxu0 %v1167_v0 }
 0x1fa   :  { %969 = vmatpush3.bf16.msra.mxu0 %v1043_v6 }
 0x1fb   :  { %970 = vmatprep.subr.bf16.mxu0 %v1167_v0 }
 0x1fe   :  { %971 = vmatpush3.bf16.msra.mxu0 %v1044_v7 }
 0x2a1   :  { %v408_v61 = vpop.f32.mrf.mxu0 }
 0x2a2   :  { %v409_v62 = vadd.f32 %v408_v61, %v325_v60 }
 0x2a3   :  { %v934_v63 = vpop.f32.mrf.mxu0 }
 0x2a4   :  { %v414_v1 = vadd.f32 %v409_v62, %v1264_v26 }
 0x2a5   :  { %v411_v2 = vpop.f32.mrf.mxu0 }
 0x2a6   :  { %v415_v3 = vmax.f32 %v414_v1, 0.0 }
 0x2a7   :  { %v935_v4 = vpop.f32.mrf.mxu0 }
 0x2a8   :  { %v418_v5 = vpack.c.bf16 %v415_v3, %v415_v3 }
 0x2aa   :  { %953 = vmatmul.mubr.bf16.vlgmr.msra.gmra.mxu1 %v418_v5 }
 0x2ab   :  { %992 = vmatprep.mubr.msk.bf16.mxu1 %vm1168_vm0, %v1167_v0  ;;  %977 = vmatpush3.bf16.msra.mxu1 %v1045_v8 }
 0x2ac   :  { %978 = vmatprep.subr.bf16.mxu1 %v1167_v0 }
 0x2af   :  { %979 = vmatpush3.bf16.msra.mxu1 %v1046_v9 }
 0x2b0   :  { %980 = vmatprep.subr.bf16.mxu1 %v1167_v0 }
 0x2b3   :  { %981 = vmatpush3.bf16.msra.mxu1 %v1047_v10 }
 0x2b4   :  { %982 = vmatprep.subr.bf16.mxu1 %v1167_v0 }
 0x2b7   :  { %983 = vmatpush3.bf16.msra.mxu1 %v1048_v11 }
 0x2b8   :  { %984 = vmatprep.subr.bf16.mxu1 %v1167_v0 }
 0x2bb   :  { %985 = vmatpush3.bf16.msra.mxu1 %v1049_v12 }
 0x2bc   :  { %986 = vmatprep.subr.bf16.mxu1 %v1167_v0 }
 0x2bf   :  { %987 = vmatpush3.bf16.msra.mxu1 %v1050_v13 }
 0x2c0   :  { %988 = vmatprep.subr.bf16.mxu1 %v1167_v0 }
 0x2c3   :  { %989 = vmatpush3.bf16.msra.mxu1 %v1051_v23 }
 0x2c4   :  { %990 = vmatprep.subr.bf16.mxu1 %v1167_v0 }
 0x2c7   :  { %991 = vmatpush3.bf16.msra.mxu1 %v1052_v24 }
 0x36a   :  { %v522_v16 = vpop.f32.mrf.mxu1 }
 0x36b   :  { %v523_v17 = vadd.f32 %v522_v16, %v439_v15 }
 0x36c   :  { %v954_v18 = vpop.f32.mrf.mxu1 }
 0x36d   :  { %v528_v19 = vmax.f32 %v523_v17, 0.0 }
 0x36e   :  { %v525_v20 = vpop.f32.mrf.mxu1 }
 0x36f   :  { %v529_v21 = vpack.c.bf16 %v528_v19, %v528_v19 }
 0x370   :  { %v955_v22 = vpop.f32.mrf.mxu1 }
 0x371   :  { %973 = vmatmul.mubr.bf16.vlgmr.msra.gmra.mxu0 %v529_v21 }
 0x431   :  { %v633_v26 = vpop.f32.mrf.mxu0 }
 0x432   :  { %v634_v27 = vadd.f32 %v633_v26, %v550_v25 }
 0x433   :  { %v974_v28 = vpop.f32.mrf.mxu0 }
 0x434   :  { %v639_v29 = vadd.f32 %v634_v27, %v415_v3 }
 0x435   :  { %v636_v30 = vpop.f32.mrf.mxu0 }
 0x436   :  { %v640_v31 = vmax.f32 %v639_v29, 0.0 }
 0x437   :  { %v975_v32 = vpop.f32.mrf.mxu0 }
 0x438   :  { %v641_v33 = vpack.c.bf16 %v640_v31, %v640_v31 }
 0x43a   :  { %993 = vmatmul.mubr.bf16.vlgmr.msra.gmra.mxu1 %v641_v33 }
 0x4fa   :  { %v747_v35 = vpop.f32.mrf.mxu1 }
 0x4fb   :  { %v748_v0 = vadd.f32 %v813_v34, %v747_v35 }
 0x4fc   :  { %v994_v36 = vpop.f32.mrf.mxu1 }
 0x4fd   :  { %753 = vst [vmem:[#allocation10] sm:$0xff] %v748_v0 }
 0x4fe   :  { %v750_v37 = vpop.f32.mrf.mxu1 }
 0x4ff   :  { %1144 = shalt.err (!%p1141_p10)
}
 0x500   :  { %763 = dma.vmem_to_hbm [thread:$0]  %s761_s26, 128, %s1326_s7, [#allocation4]   ;;  %v995_v38 = vpop.f32.mrf.mxu1 }
 0x501   :  { %1159 = dma.done.wait [#allocation4], 128  }
 0x502   :  { %1160 = vsyncadd [#allocation4], 4294967168 }
 0x503   :  { %767 = vsyncpa [#allocation3], 1 }
 0x504   :  { %768 = vsyncpa [#allocation6], 1 }
 0x505   :  { %769 = vsyncpa [#allocation9], 1 }
 0x506   :  { %770 = vsyncpa [#allocation4], 1 }

</bundles_post_ra>
